<compile_context>
chip_gen: v7x
topology: tpu7x:2x2x1
jax: 0.10.0
libtpu: 0.0.40
codegen_flags: <defaults>
</compile_context>

<pallas_src>
import math
import jax
import jax.numpy as jnp
from jax.experimental import pallas as pl
from jax.experimental.pallas import tpu as pltpu


def _round_up(x, m):
    return -(-x // m) * m


def _tpu_memory_config():
    """Per-generation VMEM budget / scoped limit and minimum grid-step count.

    v5e/v6e: 128 MiB physical VMEM, single TensorCore -> big tiles, one grid
    step is fine.  v7x: 64 MiB physical, 2 TensorCores sharing the grid via
    dimension_semantics=('parallel',) -> keep <= 48 MiB scoped and target >= 4
    grid steps (>= 2 per core) so each core can overlap its own DMA/compute.
    """
    vmem_phys = 64 * 1024 * 1024                    # conservative fallback
    try:
        vmem_phys = int(pltpu.get_tpu_info().vmem_capacity_bytes)
    except Exception:
        pass
    if vmem_phys >= 128 * 1024 * 1024:              # v5e / v6e
        return dict(budget=88 * 1024 * 1024, limit=100 * 1024 * 1024, min_steps=1)
    return dict(budget=40 * 1024 * 1024, limit=48 * 1024 * 1024, min_steps=4)


def _ppg_linear_flat_kernel(x_ref, w_ref, seg_ref, b_ref, o_ref):
    # x_ref: (tb, T*H)  w_ref: (1, T*H)  seg_ref: (T*H, T)  b_ref: (1, T)
    # Full-lane-density VPU multiply (T*H on the lane axis); the per-T
    # segmented reduction rides the otherwise-idle MXU (block-diagonal ones).
    # Accumulate in f32 (robust if callers pass bf16 inputs).
    prod = x_ref[...].astype(jnp.float32) * w_ref[...].astype(jnp.float32)
    s = jnp.dot(prod, seg_ref[...], preferred_element_type=jnp.float32)   # (tb, T)
    o_ref[...] = (s + b_ref[...].astype(jnp.float32)).astype(o_ref.dtype)
    # NOTE: the (tb, T) store is lane-masked when T < 128, but the output is
    # only 1/H of the input traffic and its HBM writeback is contiguous full
    # rows, so it stays hidden under the x DMA in this memory-bound kernel.
    # TODO(synk): emit a transposed (T, tb) lane-dense output (tb % 128 == 0)
    # if profiling ever shows the writeback on the critical path.


def _ppg_linear_3d_kernel(x_ref, w_ref, b_ref, o_ref):
    # Fallback for large T (segment matrix would not fit VMEM): VPU multiply
    # + XLU reduce over the hidden axis.
    prod = x_ref[...].astype(jnp.float32) * w_ref[...].astype(jnp.float32)
    s = jnp.sum(prod, axis=-1)                                            # (tb, T)
    o_ref[...] = (s + b_ref[...].astype(jnp.float32)).astype(o_ref.dtype)


def _choose_batch_tile(B, per_row, fixed, itemsize, budget, min_steps):
    """Batch rows per grid step: multiple of the sublane tile (8 f32 / 16 bf16),
    sized so double-buffered x + out + the f32 intermediate fit the budget."""
    sub = 8 if itemsize >= 4 else 16
    if B <= sub:
        return B                                    # full batch, always legal
    tb = max((budget - fixed) // max(per_row, 1), sub)
    if min_steps > 1:                               # v7x: feed both TensorCores
        tb = min(tb, max(-(-B // min_steps), sub))
    if tb >= B:
        return B
    return max((tb // sub) * sub, sub)


def ppg_linear(x, W, b, *, batch_tile=None, mxu_reduce=None):
    """(W * x).sum(-1) + b computed in a batched Pallas TPU kernel."""
    B, T, H = x.shape
    assert W.shape == (1, T, H)
    assert b.shape == (1, T)
    itemsize = x.dtype.itemsize
    cfg = _tpu_memory_config()

    TH = T * H
    THp = _round_up(TH, 128)                        # lane-padded flat row
    Tp = _round_up(T, 128)                          # lane-padded output row
    Hp = _round_up(H, 128)
    seg_bytes = 2 * TH * Tp * 4                     # dbl-buffered, lane-padded seg

    if mxu_reduce is None:
        mxu_reduce = seg_bytes <= cfg["budget"] // 4

    if mxu_reduce:
        x_in = x.reshape(B, TH)                     # contiguous view, free
        w_in = W.reshape(1, TH)
        seg = (jnp.arange(TH, dtype=jnp.int32)[:, None] // H
               == jnp.arange(T, dtype=jnp.int32)[None, :]).astype(jnp.float32)
        fixed = 2 * THp * max(itemsize, 4) + seg_bytes + 2 * Tp * 4
        # dbl-buffered x + f32 product intermediate + dbl-buffered out, per row
        per_row = 2 * THp * itemsize + THp * 4 + 2 * Tp * itemsize
    else:
        fixed = 2 * T * Hp * max(itemsize, 4) + 2 * Tp * 4
        per_row = 2 * T * Hp * itemsize + T * Hp * 4 + 2 * Tp * itemsize

    tb = batch_tile if batch_tile is not None else _choose_batch_tile(
        B, per_row, fixed, itemsize, cfg["budget"], cfg["min_steps"])
    grid = (pl.cdiv(B, tb),)
    # Ragged B: no jnp.pad (would double HBM traffic); Pallas clips the final
    # partial block and drops out-of-bounds stores.

    params = pltpu.CompilerParams(
        dimension_semantics=("parallel",),
        vmem_limit_bytes=cfg["limit"],
    )

    if mxu_reduce:
        return pl.pallas_call(
            _ppg_linear_flat_kernel,
            out_shape=jax.ShapeDtypeStruct((B, T), x.dtype),
            grid_spec=pltpu.PrefetchScalarGridSpec(
                num_scalar_prefetch=0,
                grid=grid,
                in_specs=[
                    pl.BlockSpec((tb, TH), lambda i: (i, 0)),   # x rows / step
                    pl.BlockSpec((1, TH), lambda i: (0, 0)),    # W (fetched once)
                    pl.BlockSpec((TH, T), lambda i: (0, 0)),    # segment matrix
                    pl.BlockSpec((1, T), lambda i: (0, 0)),     # bias
                ],
                out_specs=pl.BlockSpec((tb, T), lambda i: (i, 0)),
            ),
            compiler_params=params,
        )(x_in, w_in, seg, b)

    return pl.pallas_call(
        _ppg_linear_3d_kernel,
        out_shape=jax.ShapeDtypeStruct((B, T), x.dtype),
        grid_spec=pltpu.PrefetchScalarGridSpec(
            num_scalar_prefetch=0,
            grid=grid,
            in_specs=[
                pl.BlockSpec((tb, T, H), lambda i: (i, 0, 0)),
                pl.BlockSpec((1, T, H), lambda i: (0, 0, 0)),
                pl.BlockSpec((1, T), lambda i: (0, 0)),
            ],
            out_specs=pl.BlockSpec((tb, T), lambda i: (i, 0)),
        ),
        compiler_params=params,
    )(x, W, b)


def init_params(key, T, hidden_dim):
    """Deterministic init mirroring PPG_Linear.reset_parameters:
    W, b ~ U(-stdv, stdv) with stdv = 1/sqrt(hidden_dim)."""
    stdv = 1.0 / math.sqrt(hidden_dim)
    kw, kb = jax.random.split(key)
    W = jax.random.uniform(kw, (1, T, hidden_dim), jnp.float32, -stdv, stdv)
    b = jax.random.uniform(kb, (1, T), jnp.float32, -stdv, stdv)
    return W, b


if __name__ == "__main__":
    key = jax.random.PRNGKey(0)
    k_x, k_p, k_x2, k_x3 = jax.random.split(key, 4)

    T, H = 8, 32
    W, b = init_params(k_p, T, H)

    # Demo shape (B=2, T=8, H=32): single grid step, block == full batch.
    x = jax.random.normal(k_x, (2, T, H), jnp.float32)
    out = jax.block_until_ready(ppg_linear(x, W, b))
    ref = (W * x).sum(-1) + b
    assert out.shape == (2, T)
    assert jnp.allclose(out, ref, atol=1e-5, rtol=1e-5)

    # Multi-step pipelined path: B=64, forced 16-row tiles -> 4 grid steps.
    x2 = jax.random.normal(k_x2, (64, T, H), jnp.float32)
    out2 = jax.block_until_ready(ppg_linear(x2, W, b, batch_tile=16))
    assert jnp.allclose(out2, (W * x2).sum(-1) + b, atol=1e-5, rtol=1e-5)

    # Ragged batch, no wrapper pad: B=20 with 8-row tiles -> 3 steps, the last
    # block is clipped by Pallas (rows 20..23 are never written back).
    x3 = jax.random.normal(k_x3, (20, T, H), jnp.float32)
    out3 = jax.block_until_ready(ppg_linear(x3, W, b, batch_tile=8))
    assert jnp.allclose(out3, (W * x3).sum(-1) + b, atol=1e-5, rtol=1e-5)

    # Fallback path (XLU reduce, used when T is large enough that the segment
    # matrix would not fit VMEM): force it once so it stays covered.
    out4 = jax.block_until_ready(ppg_linear(x3, W, b, batch_tile=8, mxu_reduce=False))
    assert jnp.allclose(out4, (W * x3).sum(-1) + b, atol=1e-5, rtol=1e-5)

    print("KERNEL_OK")
</pallas_src>

<mosaic_0001>
module attributes {stable_mosaic.version = 11 : i64} {
  func.func @_ppg_linear_flat_kernel(%arg0: i32, %arg1: memref<2x256xf32, #tpu.memory_space<vmem>>, %arg2: memref<1x256xf32, #tpu.memory_space<vmem>>, %arg3: memref<256x8xf32, #tpu.memory_space<vmem>>, %arg4: memref<1x8xf32, #tpu.memory_space<vmem>>, %arg5: memref<2x8xf32, #tpu.memory_space<vmem>>) attributes {dimension_semantics = [#tpu.dimension_semantics<parallel>], iteration_bounds = array<i64: 1>, scalar_prefetch = 0 : i64, scratch_operands = 0 : i64, tpu.core_type = #tpu.core_type<tc>, window_params = [{transform_indices = @transform_0, window_bounds = array<i64: 2, 256>}, {pipeline_mode = #tpu.pipeline_mode<synchronous>, transform_indices = @transform_1, window_bounds = array<i64: 1, 256>}, {pipeline_mode = #tpu.pipeline_mode<synchronous>, transform_indices = @transform_2, window_bounds = array<i64: 256, 8>}, {pipeline_mode = #tpu.pipeline_mode<synchronous>, transform_indices = @transform_3, window_bounds = array<i64: 1, 8>}, {transform_indices = @transform_4, window_bounds = array<i64: 2, 8>}]} {
    %c0 = arith.constant 0 : index
    %c0_0 = arith.constant 0 : index
    %0 = vector.load %arg1[%c0, %c0_0] : memref<2x256xf32, #tpu.memory_space<vmem>>, vector<2x256xf32>
    %c0_1 = arith.constant 0 : index
    %c0_2 = arith.constant 0 : index
    %1 = vector.load %arg2[%c0_1, %c0_2] : memref<1x256xf32, #tpu.memory_space<vmem>>, vector<1x256xf32>
    %2 = vector.broadcast %1 : vector<1x256xf32> to vector<2x256xf32>
    %3 = arith.mulf %0, %2 : vector<2x256xf32>
    %c0_3 = arith.constant 0 : index
    %c0_4 = arith.constant 0 : index
    %4 = vector.load %arg3[%c0_3, %c0_4] : memref<256x8xf32, #tpu.memory_space<vmem>>, vector<256x8xf32>
    %cst = arith.constant dense<0.000000e+00> : vector<2x8xf32>
    %5 = tpu.matmul %3, %4, %cst {dimension_numbers = #tpu.dot_dimension_numbers<[1], [0], [0], [1], [0, 0, 1, 1], [], []>} : vector<2x256xf32>, vector<256x8xf32>, vector<2x8xf32> -> vector<2x8xf32>
    %c0_5 = arith.constant 0 : index
    %c0_6 = arith.constant 0 : index
    %6 = vector.load %arg4[%c0_5, %c0_6] : memref<1x8xf32, #tpu.memory_space<vmem>>, vector<1x8xf32>
    %7 = vector.broadcast %6 : vector<1x8xf32> to vector<2x8xf32>
    %8 = arith.addf %5, %7 : vector<2x8xf32>
    %c0_7 = arith.constant 0 : index
    %c0_8 = arith.constant 0 : index
    %9 = vector.load %arg5[%c0_7, %c0_8] : memref<2x8xf32, #tpu.memory_space<vmem>>, vector<2x8xf32>
    tpu.vector_store %arg5[%c0_7, %c0_8], %8 {strides = array<i32>} : memref<2x8xf32, #tpu.memory_space<vmem>>, vector<2x8xf32>,
    return
  }
  func.func @transform_0(%arg0: i32) -> (i32, i32) {
    %c0_i32 = arith.constant 0 : i32
    %c0_i32_0 = arith.constant 0 : i32
    return %arg0, %c0_i32 : i32, i32
  }
  func.func @transform_1(%arg0: i32) -> (i32, i32) {
    %c0_i32 = arith.constant 0 : i32
    %c0_i32_0 = arith.constant 0 : i32
    %c0_i32_1 = arith.constant 0 : i32
    return %c0_i32, %c0_i32_0 : i32, i32
  }
  func.func @transform_2(%arg0: i32) -> (i32, i32) {
    %c0_i32 = arith.constant 0 : i32
    %c0_i32_0 = arith.constant 0 : i32
    %c0_i32_1 = arith.constant 0 : i32
    return %c0_i32, %c0_i32_0 : i32, i32
  }
  func.func @transform_3(%arg0: i32) -> (i32, i32) {
    %c0_i32 = arith.constant 0 : i32
    %c0_i32_0 = arith.constant 0 : i32
    %c0_i32_1 = arith.constant 0 : i32
    return %c0_i32, %c0_i32_0 : i32, i32
  }
  func.func @transform_4(%arg0: i32) -> (i32, i32) {
    %c0_i32 = arith.constant 0 : i32
    %c0_i32_0 = arith.constant 0 : i32
    return %arg0, %c0_i32 : i32, i32
  }
}

</mosaic_0001>

<bundles_post_ra>
// kernel: tpu_custom_call.1
= control target key start
LH: loop header
LB: loop body
LE: loop exit
PB: predicated region body
PF: predicated region fallthrough
CT: control target
= control target key end

     0   :  { %v21_v3 = vlaneseq  ;;  %v269_v16 = vmov 1983009808   ;;  %s413_s0 = inlined_call_operand.vmem [shape: f32[2,256], index: 0, kind: input, shape index: {}]   ;;  %s414_s1 = inlined_call_operand.vmem [shape: f32[1,256], index: 1, kind: input, shape index: {}]   ;;  %s415_s2 = inlined_call_operand.vmem [shape: f32[256,8], index: 2, kind: input, shape index: {}]   ;;  %s416_s3 = inlined_call_operand.vmem [shape: f32[1,8], index: 3, kind: input, shape index: {}]   ;;  %s417_s4 = inlined_call_operand.hbm [shape: f32[2,8], index: 4, kind: output, shape index: {}]  }
   0x1   :  { %v55_v0 = vld [vmem:[%s415_s2 + $0x80] sm:$0xff]  ;;  %v56_v1 = vld [vmem:[%s415_s2 + $0x88] sm:$0xff]  ;;  %v57_v6 = vld [vmem:[%s415_s2 + $0x90] sm:$0xff]  ;;  %v31_v17 = vunpack.c.l.s4 %v269_v16 }
   0x2   :  { %v39_v2 = vld [vmem:[%s415_s2] sm:$0xff]  ;;  %v211_v4 = vpack.c.bf16 %v56_v1, %v55_v0  ;;  %v40_v5 = vld [vmem:[%s415_s2 + $0x8] sm:$0xff]  ;;  %v58_v7 = vld [vmem:[%s415_s2 + $0x98] sm:$0xff]  ;;  %v22_v15 = vshrl.u32 %v21_v3, 7 }
   0x3   :  { %v213_v8 = vpack.c.bf16 %v40_v5, %v39_v2  ;;  %v215_v9 = vpack.c.bf16 %v58_v7, %v57_v6  ;;  %v41_v10 = vld [vmem:[%s415_s2 + $0x10] sm:$0xff]  ;;  %v42_v11 = vld [vmem:[%s415_s2 + $0x18] sm:$0xff]  ;;  %v59_v12 = vld [vmem:[%s415_s2 + $0xa0] sm:$0xff]  ;;  %v32_v26 = vunpack.c.0.s8 %v31_v17 }
   0x4   :  { %212 = vmatprep.subr.bf16.mxu0 %v211_v4  ;;  %v60_v13 = vld [vmem:[%s415_s2 + $0xa8] sm:$0xff]  ;;  %v217_v14 = vpack.c.bf16 %v42_v11, %v41_v10  ;;  %v43_v19 = vld [vmem:[%s415_s2 + $0x20] sm:$0xff]  ;;  %v61_v21 = vld [vmem:[%s415_s2 + $0xb0] sm:$0xff]  ;;  %v23_v24 = vsub.s32 0, %v22_v15  ;;  %v27_v25 = vsub.s32 1, %v22_v15 }
   0x5   :  { %214 = vmatpush3.bf16.msra.mxu0 %v213_v8  ;;  %v219_v18 = vpack.c.bf16 %v60_v13, %v59_v12  ;;  %v44_v20 = vld [vmem:[%s415_s2 + $0x28] sm:$0xff]  ;;  %v62_v22 = vld [vmem:[%s415_s2 + $0xb8] sm:$0xff]  ;;  %v45_v28 = vld [vmem:[%s415_s2 + $0x30] sm:$0xff] }
   0x6   :  { %216 = vmatprep.subr.bf16.mxu0 %v215_v9  ;;  %v221_v23 = vpack.c.bf16 %v44_v20, %v43_v19  ;;  %v223_v27 = vpack.c.bf16 %v62_v22, %v61_v21  ;;  %v46_v29 = vld [vmem:[%s415_s2 + $0x38] sm:$0xff]  ;;  %v63_v30 = vld [vmem:[%s415_s2 + $0xc0] sm:$0xff]  ;;  %v64_v31 = vld [vmem:[%s415_s2 + $0xc8] sm:$0xff] }
   0x7   :  { %v19_v32 = vld [vmem:[%s414_s1] sm:$0x3] }
   0x9   :  { %218 = vmatpush3.bf16.msra.mxu0 %v217_v14 }
   0xa   :  { %220 = vmatprep.subr.bf16.mxu0 %v219_v18 }
   0xb   :  { %9 = vsyncpa [#allocation3], 0  ;;  %v225_v33 = vpack.c.bf16 %v46_v29, %v45_v28  ;;  %v24_v34 = vrot.slane %v19_v32, %v23_v24  ;;  %v28_v35 = vrot.slane %v19_v32, %v27_v25  ;;  %v35_v36 = vsub.s32 %v32_v26, %v22_v15  ;;  %v47_v38 = vld [vmem:[%s415_s2 + $0x40] sm:$0xff]  ;;  %v48_v39 = vld [vmem:[%s415_s2 + $0x48] sm:$0xff]  ;;  %s270_s5 = smov [#allocation2]  }
   0xc   :  { %v227_v37 = vpack.c.bf16 %v64_v31, %v63_v30  ;;  %v65_v40 = vld [vmem:[%s415_s2 + $0xd0] sm:$0xff]  ;;  %v66_v41 = vld [vmem:[%s415_s2 + $0xd8] sm:$0xff]  ;;  %v18_v43 = vld [vmem:[%s413_s0] sm:$0xf]  ;;  %v229_v44 = vpack.c.bf16 %v48_v39, %v47_v38  ;;  %s167_s6 = sshll.u32 %s270_s5, 4  ;;  %vm159_vm0 = vcmask 58368   ;;  %s168_s6 = int_to_ptr.vmem [resolvable:$true] %s167_s6 }
   0xd   :  { %222 = vmatpush3.bf16.msra.mxu0 %v221_v23  ;;  %v29_v42 = vcombine.low %v24_v34, %v28_v35  ;;  %v231_v46 = vpack.c.bf16 %v66_v41, %v65_v40  ;;  %v49_v47 = vld [vmem:[%s415_s2 + $0x50] sm:$0xff]  ;;  %v50_v48 = vld [vmem:[%s415_s2 + $0x58] sm:$0xff]  ;;  %v67_v49 = vld [vmem:[%s415_s2 + $0xe0] sm:$0xff]  ;;  %s245_s1 = scalar_lea.vmem %s168_s6, 32  ;;  %p250_p1 = scmp.lt.s32.totalorder %s168_s6, %s168_s6 }
   0xe   :  { %224 = vmatprep.subr.bf16.mxu0 %v223_v27  ;;  %v68_v50 = vld [vmem:[%s415_s2 + $0xe8] sm:$0xff]  ;;  %v233_v52 = vpack.c.bf16 %v50_v48, %v49_v47  ;;  %v51_v55 = vld [vmem:[%s415_s2 + $0x60] sm:$0xff]  ;;  %v69_v57 = vld [vmem:[%s415_s2 + $0xf0] sm:$0xff]  ;;  %p246_p0 = scmp.ne.s32.totalorder %s168_s6, %s245_s1  ;;  %p251_p2 = scmp.lt.s32.totalorder %s245_s1, %s245_s1 }
   0xf   :  { %v36_v45 = vrot.slane %v29_v42, %v35_v36  ;;  %v235_v54 = vpack.c.bf16 %v68_v50, %v67_v49  ;;  %v52_v56 = vld [vmem:[%s415_s2 + $0x68] sm:$0xff]  ;;  %v70_v58 = vld [vmem:[%s415_s2 + $0xf8] sm:$0xff]  ;;  %v53_v62 = vld [vmem:[%s415_s2 + $0x70] sm:$0xff] }
  0x10   :  { %v237_v60 = vpack.c.bf16 %v52_v56, %v51_v55  ;;  %v239_v61 = vpack.c.bf16 %v70_v58, %v69_v57  ;;  %v54_v63 = vld [vmem:[%s415_s2 + $0x78] sm:$0xff]  ;;  %v175_v2 = vld [vmem:[%s416_s3] ss:$0 sm:$0xff]  ;;  %p252_p3 = por %p251_p2, %p250_p1 }
  0x11   :  { %226 = vmatpush3.bf16.msra.mxu0 %v225_v33  ;;  %v38_v51 = vmul.f32 %v36_v45, %v18_v43  ;;  %v241_v0 = vpack.c.bf16 %v54_v63, %v53_v62 }
  0x12   :  { %228 = vmatprep.subr.bf16.mxu0 %v227_v37  ;;  %p253_p4 = pnand %p252_p3, %p246_p0 }
  0x13   :  { %v85_v53 = vrot.slane %v38_v51, %v35_v36 }
  0x15   :  { %230 = vmatpush3.bf16.msra.mxu0 %v229_v44  ;;  %v86_v59 = vcombine.high %v85_v53, %v85_v53 }
  0x16   :  { %232 = vmatprep.subr.bf16.mxu0 %v231_v46 }
  0x17   :  { %153 = vmatprep.mubr.f32.mxu0 %v86_v59 }
  0x19   :  { %234 = vmatpush3.bf16.msra.mxu0 %v233_v52 }
  0x1a   :  { %236 = vmatprep.subr.bf16.mxu0 %v235_v54 }
  0x1d   :  { %238 = vmatpush3.bf16.msra.mxu0 %v237_v60 }
  0x1e   :  { %240 = vmatprep.subr.bf16.mxu0 %v239_v61 }
  0x21   :  { %242 = vmatpush3.bf16.msra.mxu0 %v241_v0 }
  0x24   :  { %154 = vmatmul.mubr.f32.vlgmr.msra.gmra.mrb[0].mxu0 %v85_v53 }
  0xf7   :  { %v208_v1 = vpop.f32.mrb[0].mxu0 }
  0xf8   :  { %v209_v3 = vpop.f32.mrb[1].mxu0 }
  0xf9   :  { %v210_v4 = vadd.f32 %v209_v3, %v208_v1 }
  0xfb   :  { %v156_v5 = vadd.f32 %v210_v4, %v175_v2 }
  0xfd   :  { %160 = vst.msk [vmem:[#allocation2] sm:$0x3] %vm159_vm0, %v156_v5 }
  0xfe   :  { %256 = shalt.err (!%p253_p4)
}
  0xff   :  { %s257_s8 = scalar_lea.hbm %s417_s4, 32 }
 0x100   :  { %p258_p5 = scmp.ne.s32.totalorder %s417_s4, %s257_s8  ;;  %p261_p6 = scmp.lt.u32.totalorder %s257_s8, %s417_s4 }
 0x102   :  { %p263_p7 = pnand %p261_p6, %p258_p5 }
 0x104   :  { %266 = shalt.err (!%p263_p7)
}
 0x105   :  { %170 = dma.vmem_to_hbm [thread:$0]  %s168_s6, 32, %s417_s4, [#allocation3]  }
 0x106   :  { %267 = dma.done.wait [#allocation3], 32  }
 0x107   :  { %268 = vsyncadd [#allocation3], 4294967264 }
 0x108   :  { %174 = vsyncpa [#allocation3], 1 }

</bundles_post_ra>
